<compile_context>
chip_gen: v6e
topology: v6e:2x2x1
jax: 0.10.0
libtpu: 0.0.40
codegen_flags: <defaults>
</compile_context>

<pallas_src>
import numpy as np
import jax
import jax.numpy as jnp
from jax import lax
from jax.experimental import pallas as pl
from jax.experimental.pallas import tpu as pltpu

BERT_DIM = 768
HIDDEN_DIM = 100   # module default hidden_dim=100
H_PAD = 128        # hidden dim padded to one full lane width


def _round_up(x, m):
    return (x + m - 1) // m * m


def bert_aligner_forward(positive_tensor, positive_lengths, embedding_table,
                         fc_w, fc_b, ques_max_len=None, pos_max_len=None):
    """Mirrors BertAlignerModel.forward(mode='train', negative_tensor=None)."""
    # --- glue: synthetic stand-in for BERT hidden layer -2, [CLS]/[SEP] stripped
    bert_out = embedding_table[positive_tensor][:, 1:-1, :]          # (B, S', 768)
    B, sp, _ = bert_out.shape

    # positive_lengths.permute(1, 0): row0 = question len, row1 = column len.
    # Lengths are tiny and host-resident; maxes computed host-side.
    lengths_np = np.asarray(positive_lengths).T.astype(np.int32)     # (2, B)
    q_max = int(ques_max_len) if ques_max_len is not None else int(lengths_np[0].max())
    p_max = int(pos_max_len) if pos_max_len is not None else int(lengths_np[1].max())

    q_pad = _round_up(max(q_max, 1), 8)          # sublane-aligned
    p_pad = _round_up(max(p_max, 1), 128)        # lane-dense output stores
    sp_pad = _round_up(sp, 8)

    bt = min(8, B)                               # batch tile per grid step
    b_pad = _round_up(B, bt)
    rows = bt * sp_pad                           # M of the fused fc matmul
    # scratch rows: enough for the whole fc-output slab plus a zeroed tail so
    # every (possibly clamped) dynamic p-slice and every static q-slice stays
    # in bounds.
    scr_rows = _round_up(max(rows + p_pad, (bt - 1) * sp_pad + q_pad) + 8, 8)

    H = fc_w.shape[1]
    assert H <= H_PAD

    # --- wrapper-side layout plumbing: pad, flatten to a lane/sublane-dense slab
    bert_p = jnp.zeros((b_pad, sp_pad, BERT_DIM), jnp.float32)
    bert_p = bert_p.at[:B, :sp, :].set(bert_out.astype(jnp.float32))
    bert_2d = bert_p.reshape(b_pad * sp_pad, BERT_DIM).astype(jnp.bfloat16)

    lens_np = np.zeros((2, b_pad), np.int32)
    lens_np[:, :B] = lengths_np
    lens_p = jnp.asarray(lens_np)

    w_p = jnp.zeros((BERT_DIM, H_PAD), jnp.float32).at[:, :H].set(
        fc_w.astype(jnp.float32)).astype(jnp.bfloat16)
    b_p = jnp.zeros((1, H_PAD), jnp.float32).at[0, :H].set(fc_b.astype(jnp.float32))

    def kernel(len_ref, bert_ref, w_ref, bias_ref, sim_ref, h_scratch):
        t = pl.program_id(0)

        # --- fused fc over the whole batch tile: bf16 MXU, f32 accumulate ----
        logits = jnp.dot(bert_ref[...], w_ref[...],
                         preferred_element_type=jnp.float32)        # (rows, 128)
        h = jax.nn.sigmoid(logits + bias_ref[0, :])                  # f32
        # mandatory: re-zero the padded hidden columns (sigmoid(0) = 0.5)
        lane = lax.broadcasted_iota(jnp.int32, (rows, H_PAD), 1)
        h = jnp.where(lane < H, h, 0.0)

        # stage the fc output in scratch so the data-dependent column split is
        # a cheap dynamic sublane slice on a ref; zero the tail so any clamped
        # slice reads zeros.
        h_scratch[0:rows, :] = h
        h_scratch[rows:scr_rows, :] = jnp.zeros((scr_rows - rows, H_PAD),
                                                jnp.float32)

        # --- per-sequence split + cosine similarity ---------------------------
        for i in range(bt):                      # bt is small & static: unrolled
            b = t * bt + i
            qlen = len_ref[0, b]
            plen = len_ref[1, b]

            # question rows [0, qlen): static sublane slice
            q_blk = h_scratch[i * sp_pad:i * sp_pad + q_pad, :]      # (q_pad, 128)
            q_rows = lax.broadcasted_iota(jnp.int32, (q_pad, 1), 0)
            q_mat = jnp.where(q_rows < qlen, q_blk, 0.0)

            # column rows [qlen+1, qlen+1+plen): dynamic sublane slice.
            # Clamp keeps the slice in bounds; masking by plen keeps it correct.
            p_start = jnp.minimum(i * sp_pad + qlen + 1, scr_rows - p_pad)
            p_blk = h_scratch[pl.ds(p_start, p_pad), :]              # (p_pad, 128)
            p_rows = lax.broadcasted_iota(jnp.int32, (p_pad, 1), 0)
            p_mat = jnp.where(p_rows < plen, p_blk, 0.0)

            # cosine similarity: bf16 MXU dot (contract on last dim, no explicit
            # transpose), f32 accumulation, rsqrt-normalized.
            dots = lax.dot_general(q_mat.astype(jnp.bfloat16),
                                   p_mat.astype(jnp.bfloat16),
                                   (((1,), (1,)), ((), ())),
                                   preferred_element_type=jnp.float32)  # (q_pad, p_pad)
            inv_q = lax.rsqrt(jnp.sum(q_mat * q_mat, axis=-1, keepdims=True) + 1e-8)
            inv_p = lax.rsqrt(jnp.sum(p_mat * p_mat, axis=-1, keepdims=True) + 1e-8)
            sim_ref[i] = dots * inv_q * inv_p.T

    grid_spec = pltpu.PrefetchScalarGridSpec(
        num_scalar_prefetch=1,
        grid=(b_pad // bt,),
        in_specs=[
            pl.BlockSpec((rows, BERT_DIM), lambda t, lens: (t, 0)),
            pl.BlockSpec((BERT_DIM, H_PAD), lambda t, lens: (0, 0)),
            pl.BlockSpec((1, H_PAD), lambda t, lens: (0, 0)),
        ],
        out_specs=pl.BlockSpec((bt, q_pad, p_pad), lambda t, lens: (t, 0, 0)),
        scratch_shapes=[pltpu.VMEM((scr_rows, H_PAD), jnp.float32)],
    )

    sim = pl.pallas_call(
        kernel,
        out_shape=jax.ShapeDtypeStruct((b_pad, q_pad, p_pad), jnp.float32),
        grid_spec=grid_spec,
        compiler_params=pltpu.CompilerParams(
            dimension_semantics=("parallel",),
            # NOTE: for real BERT shapes (S' ~ 510, large B) raise
            # vmem_limit_bytes and/or shrink bt; at these sizes defaults suffice.
        ),
    )(lens_p, bert_2d, w_p, b_p)

    # slice away the lane/sublane/batch padding
    return sim[:B, :q_max, :p_max]


def reference_forward(positive_tensor, positive_lengths, embedding_table, fc_w, fc_b):
    bert_out = np.asarray(embedding_table)[np.asarray(positive_tensor)][:, 1:-1, :]
    lengths_t = np.asarray(positive_lengths).T
    h = 1.0 / (1.0 + np.exp(-(bert_out @ np.asarray(fc_w) + np.asarray(fc_b))))
    B = h.shape[0]
    q_max = int(lengths_t[0].max())
    p_max = int(lengths_t[1].max())
    H = h.shape[-1]
    q_mat = np.zeros((B, q_max, H), np.float32)
    p_mat = np.zeros((B, p_max, H), np.float32)
    for b in range(B):
        ql = int(lengths_t[0, b]); cl = int(lengths_t[1, b])
        q_mat[b, :ql] = h[b, :ql]
        p_mat[b, :cl] = h[b, ql + 1: ql + 1 + cl]
    dots = np.einsum('bqh,bph->bqp', q_mat, p_mat)
    nq = np.linalg.norm(q_mat, axis=-1)
    npm = np.linalg.norm(p_mat, axis=-1)
    return dots / (nq[:, :, None] * npm[:, None, :] + 1e-8)


if __name__ == "__main__":
    key = jax.random.PRNGKey(0)
    k_emb, k_w, k_b, k_tok = jax.random.split(key, 4)

    B = 2          # batch
    S = 16         # raw token sequence length (incl. [CLS]/[SEP]); S' = 14
    VOCAB = 50

    # deterministic synthetic parameters / inputs
    embedding_table = jax.random.normal(k_emb, (VOCAB, BERT_DIM), jnp.float32) * 0.5
    fc_w = jax.random.normal(k_w, (BERT_DIM, HIDDEN_DIM), jnp.float32) * 0.05
    fc_b = jax.random.normal(k_b, (HIDDEN_DIM,), jnp.float32) * 0.05

    positive_tensor = jax.random.randint(k_tok, (B, S), 0, VOCAB, jnp.int32)
    # positive_lengths: (B, 2) = (question_len, column_len); qlen+plen+1 <= S-2
    positive_lengths = np.array([[5, 4],
                                 [7, 6]], dtype=np.int32)

    sim = bert_aligner_forward(positive_tensor, positive_lengths,
                               embedding_table, fc_w, fc_b)
    sim = jax.block_until_ready(sim)

    ref = reference_forward(positive_tensor, positive_lengths,
                            embedding_table, fc_w, fc_b)
    # bf16 MXU operands (f32 accumulation) vs the pure-f32 numpy reference
    np.testing.assert_allclose(np.asarray(sim), ref, rtol=2e-2, atol=2e-2)

    print("KERNEL_OK")
</pallas_src>

<mosaic_0001>
module attributes {stable_mosaic.version = 11 : i64} {
  func.func @kernel(%arg0: i32, %arg1: memref<2x2xi32, #tpu.memory_space<smem>>, %arg2: memref<32x768xbf16, #tpu.memory_space<vmem>>, %arg3: memref<768x128xbf16, #tpu.memory_space<vmem>>, %arg4: memref<1x128xf32, #tpu.memory_space<vmem>>, %arg5: memref<2x8x128xf32, #tpu.memory_space<vmem>>, %arg6: memref<168x128xf32, #tpu.memory_space<vmem>>) attributes {dimension_semantics = [#tpu.dimension_semantics<parallel>], iteration_bounds = array<i64: 1>, scalar_prefetch = 1 : i64, scratch_operands = 1 : i64, tpu.core_type = #tpu.core_type<tc>, window_params = [{transform_indices = @transform_0, window_bounds = array<i64: 32, 768>}, {pipeline_mode = #tpu.pipeline_mode<synchronous>, transform_indices = @transform_1, window_bounds = array<i64: 768, 128>}, {pipeline_mode = #tpu.pipeline_mode<synchronous>, transform_indices = @transform_2, window_bounds = array<i64: 1, 128>}, {transform_indices = @transform_3, window_bounds = array<i64: 2, 8, 128>}]} {
    %c0 = arith.constant 0 : index
    %c0_0 = arith.constant 0 : index
    %0 = vector.load %arg2[%c0, %c0_0] : memref<32x768xbf16, #tpu.memory_space<vmem>>, vector<32x768xbf16>
    %c0_1 = arith.constant 0 : index
    %c0_2 = arith.constant 0 : index
    %1 = vector.load %arg3[%c0_1, %c0_2] : memref<768x128xbf16, #tpu.memory_space<vmem>>, vector<768x128xbf16>
    %cst = arith.constant dense<0.000000e+00> : vector<32x128xf32>
    %2 = tpu.matmul %0, %1, %cst {dimension_numbers = #tpu.dot_dimension_numbers<[1], [0], [0], [1], [0, 0, 1, 1], [], []>} : vector<32x768xbf16>, vector<768x128xbf16>, vector<32x128xf32> -> vector<32x128xf32>
    %c0_3 = arith.constant 0 : index
    %c0_4 = arith.constant 0 : index
    %3 = vector.load %arg4[%c0_3, %c0_4] : memref<1x128xf32, #tpu.memory_space<vmem>>, vector<1x128xf32>
    %4 = vector.shape_cast %3 : vector<1x128xf32> to vector<128xf32>
    %5 = vector.shape_cast %4 : vector<128xf32> to vector<1x128xf32>
    %6 = vector.broadcast %5 : vector<1x128xf32> to vector<32x128xf32>
    %7 = arith.addf %2, %6 : vector<32x128xf32>
    %8 = arith.negf %7 : vector<32x128xf32>
    %9 = math.exp %8 : vector<32x128xf32>
    %cst_5 = arith.constant 1.000000e+00 : f32
    %10 = vector.broadcast %cst_5 : f32 to vector<32x128xf32>
    %11 = arith.addf %10, %9 : vector<32x128xf32>
    %12 = arith.divf %10, %11 : vector<32x128xf32>
    %13 = tpu.iota {dimensions = array<i32: 1>} : vector<32x128xi32>
    %c100_i32 = arith.constant 100 : i32
    %14 = vector.broadcast %c100_i32 : i32 to vector<32x128xi32>
    %15 = arith.cmpi slt, %13, %14 : vector<32x128xi32>
    %cst_6 = arith.constant 0.000000e+00 : f32
    %16 = vector.broadcast %cst_6 : f32 to vector<32x128xf32>
    %17 = arith.select %15, %12, %16 : vector<32x128xi1>, vector<32x128xf32>
    %c0_7 = arith.constant 0 : index
    %c0_8 = arith.constant 0 : index
    %18 = vector.load %arg6[%c0_7, %c0_8] : memref<168x128xf32, #tpu.memory_space<vmem>>, vector<32x128xf32>
    tpu.vector_store %arg6[%c0_7, %c0_8], %17 {strides = array<i32>} : memref<168x128xf32, #tpu.memory_space<vmem>>, vector<32x128xf32>,
    %cst_9 = arith.constant 0.000000e+00 : f32
    %19 = vector.broadcast %cst_9 : f32 to vector<136x128xf32>
    %c32 = arith.constant 32 : index
    %c0_10 = arith.constant 0 : index
    %20 = vector.load %arg6[%c32, %c0_10] : memref<168x128xf32, #tpu.memory_space<vmem>>, vector<136x128xf32>
    tpu.vector_store %arg6[%c32, %c0_10], %19 {strides = array<i32>} : memref<168x128xf32, #tpu.memory_space<vmem>>, vector<136x128xf32>,
    %c2_i32 = arith.constant 2 : i32
    %21 = arith.muli %arg0, %c2_i32 : i32
    %c0_i32 = arith.constant 0 : i32
    %22 = arith.addi %21, %c0_i32 : i32
    %c0_11 = arith.constant 0 : index
    %23 = arith.index_cast %22 : i32 to index
    %24 = memref.load %arg1[%c0_11, %23] : memref<2x2xi32, #tpu.memory_space<smem>>
    %c1 = arith.constant 1 : index
    %25 = arith.index_cast %22 : i32 to index
    %26 = memref.load %arg1[%c1, %25] : memref<2x2xi32, #tpu.memory_space<smem>>
    %c0_12 = arith.constant 0 : index
    %c0_13 = arith.constant 0 : index
    %27 = vector.load %arg6[%c0_12, %c0_13] : memref<168x128xf32, #tpu.memory_space<vmem>>, vector<8x128xf32>
    %28 = tpu.iota {dimensions = array<i32: 0>} : vector<8x1xi32>
    %29 = vector.broadcast %24 : i32 to vector<8x1xi32>
    %30 = arith.cmpi slt, %28, %29 : vector<8x1xi32>
    %cst_14 = arith.constant 0.000000e+00 : f32
    %31 = vector.shape_cast %30 : vector<8x1xi1> to vector<8x1xi1>
    %32 = vector.broadcast %31 : vector<8x1xi1> to vector<8x128xi1>
    %33 = vector.broadcast %cst_14 : f32 to vector<8x128xf32>
    %34 = arith.select %32, %27, %33 : vector<8x128xi1>, vector<8x128xf32>
    %c0_i32_15 = arith.constant 0 : i32
    %35 = arith.addi %c0_i32_15, %24 : i32
    %c1_i32 = arith.constant 1 : i32
    %36 = arith.addi %35, %c1_i32 : i32
    %c40_i32 = arith.constant 40 : i32
    %37 = arith.minsi %36, %c40_i32 : i32
    %38 = arith.index_cast %37 : i32 to index
    %c0_16 = arith.constant 0 : index
    %39 = vector.load %arg6[%38, %c0_16] : memref<168x128xf32, #tpu.memory_space<vmem>>, vector<128x128xf32>
    %40 = tpu.iota {dimensions = array<i32: 0>} : vector<128x1xi32>
    %41 = vector.broadcast %26 : i32 to vector<128x1xi32>
    %42 = arith.cmpi slt, %40, %41 : vector<128x1xi32>
    %cst_17 = arith.constant 0.000000e+00 : f32
    %43 = vector.shape_cast %42 : vector<128x1xi1> to vector<128x1xi1>
    %44 = vector.broadcast %43 : vector<128x1xi1> to vector<128x128xi1>
    %45 = vector.broadcast %cst_17 : f32 to vector<128x128xf32>
    %46 = arith.select %44, %39, %45 : vector<128x128xi1>, vector<128x128xf32>
    %47 = arith.truncf %34 : vector<8x128xf32> to vector<8x128xbf16>
    %48 = arith.truncf %46 : vector<128x128xf32> to vector<128x128xbf16>
    %cst_18 = arith.constant dense<0.000000e+00> : vector<8x128xf32>
    %49 = tpu.matmul %47, %48, %cst_18 {dimension_numbers = #tpu.dot_dimension_numbers<[1], [1], [0], [0], [0, 0, 1, 0], [], []>} : vector<8x128xbf16>, vector<128x128xbf16>, vector<8x128xf32> -> vector<8x128xf32>
    %50 = arith.mulf %34, %34 : vector<8x128xf32>
    %cst_19 = arith.constant dense<0.000000e+00> : vector<8xf32>
    %51 = vector.multi_reduction <add>, %50, %cst_19 [1] : vector<8x128xf32> to vector<8xf32>
    %52 = vector.shape_cast %51 : vector<8xf32> to vector<8x1xf32>
    %cst_20 = arith.constant 9.99999993E-9 : f32
    %53 = vector.broadcast %cst_20 : f32 to vector<8x1xf32>
    %54 = arith.addf %52, %53 : vector<8x1xf32>
    %55 = math.rsqrt %54 : vector<8x1xf32>
    %56 = arith.mulf %46, %46 : vector<128x128xf32>
    %cst_21 = arith.constant dense<0.000000e+00> : vector<128xf32>
    %57 = vector.multi_reduction <add>, %56, %cst_21 [1] : vector<128x128xf32> to vector<128xf32>
    %58 = vector.shape_cast %57 : vector<128xf32> to vector<128x1xf32>
    %cst_22 = arith.constant 9.99999993E-9 : f32
    %59 = vector.broadcast %cst_22 : f32 to vector<128x1xf32>
    %60 = arith.addf %58, %59 : vector<128x1xf32>
    %61 = math.rsqrt %60 : vector<128x1xf32>
    %62 = vector.broadcast %55 : vector<8x1xf32> to vector<8x128xf32>
    %63 = arith.mulf %49, %62 : vector<8x128xf32>
    %64 = tpu.transpose %61, [1, 0] : vector<128x1xf32> -> vector<1x128xf32>
    %65 = vector.broadcast %64 : vector<1x128xf32> to vector<8x128xf32>
    %66 = arith.mulf %63, %65 : vector<8x128xf32>
    %c0_23 = arith.constant 0 : index
    %c0_24 = arith.constant 0 : index
    %c0_25 = arith.constant 0 : index
    %67 = vector.load %arg5[%c0_23, %c0_24, %c0_25] : memref<2x8x128xf32, #tpu.memory_space<vmem>>, vector<1x8x128xf32>
    %68 = vector.shape_cast %67 : vector<1x8x128xf32> to vector<8x128xf32>
    %69 = vector.shape_cast %66 : vector<8x128xf32> to vector<1x8x128xf32>
    tpu.vector_store %arg5[%c0_23, %c0_24, %c0_25], %69 {strides = array<i32>} : memref<2x8x128xf32, #tpu.memory_space<vmem>>, vector<1x8x128xf32>,
    %c2_i32_26 = arith.constant 2 : i32
    %70 = arith.muli %arg0, %c2_i32_26 : i32
    %c1_i32_27 = arith.constant 1 : i32
    %71 = arith.addi %70, %c1_i32_27 : i32
    %c0_28 = arith.constant 0 : index
    %72 = arith.index_cast %71 : i32 to index
    %73 = memref.load %arg1[%c0_28, %72] : memref<2x2xi32, #tpu.memory_space<smem>>
    %c1_29 = arith.constant 1 : index
    %74 = arith.index_cast %71 : i32 to index
    %75 = memref.load %arg1[%c1_29, %74] : memref<2x2xi32, #tpu.memory_space<smem>>
    %c16 = arith.constant 16 : index
    %c0_30 = arith.constant 0 : index
    %76 = vector.load %arg6[%c16, %c0_30] : memref<168x128xf32, #tpu.memory_space<vmem>>, vector<8x128xf32>
    %77 = tpu.iota {dimensions = array<i32: 0>} : vector<8x1xi32>
    %78 = vector.broadcast %73 : i32 to vector<8x1xi32>
    %79 = arith.cmpi slt, %77, %78 : vector<8x1xi32>
    %cst_31 = arith.constant 0.000000e+00 : f32
    %80 = vector.shape_cast %79 : vector<8x1xi1> to vector<8x1xi1>
    %81 = vector.broadcast %80 : vector<8x1xi1> to vector<8x128xi1>
    %82 = vector.broadcast %cst_31 : f32 to vector<8x128xf32>
    %83 = arith.select %81, %76, %82 : vector<8x128xi1>, vector<8x128xf32>
    %c16_i32 = arith.constant 16 : i32
    %84 = arith.addi %c16_i32, %73 : i32
    %c1_i32_32 = arith.constant 1 : i32
    %85 = arith.addi %84, %c1_i32_32 : i32
    %c40_i32_33 = arith.constant 40 : i32
    %86 = arith.minsi %85, %c40_i32_33 : i32
    %87 = arith.index_cast %86 : i32 to index
    %c0_34 = arith.constant 0 : index
    %88 = vector.load %arg6[%87, %c0_34] : memref<168x128xf32, #tpu.memory_space<vmem>>, vector<128x128xf32>
    %89 = tpu.iota {dimensions = array<i32: 0>} : vector<128x1xi32>
    %90 = vector.broadcast %75 : i32 to vector<128x1xi32>
    %91 = arith.cmpi slt, %89, %90 : vector<128x1xi32>
    %cst_35 = arith.constant 0.000000e+00 : f32
    %92 = vector.shape_cast %91 : vector<128x1xi1> to vector<128x1xi1>
    %93 = vector.broadcast %92 : vector<128x1xi1> to vector<128x128xi1>
    %94 = vector.broadcast %cst_35 : f32 to vector<128x128xf32>
    %95 = arith.select %93, %88, %94 : vector<128x128xi1>, vector<128x128xf32>
    %96 = arith.truncf %83 : vector<8x128xf32> to vector<8x128xbf16>
    %97 = arith.truncf %95 : vector<128x128xf32> to vector<128x128xbf16>
    %cst_36 = arith.constant dense<0.000000e+00> : vector<8x128xf32>
    %98 = tpu.matmul %96, %97, %cst_36 {dimension_numbers = #tpu.dot_dimension_numbers<[1], [1], [0], [0], [0, 0, 1, 0], [], []>} : vector<8x128xbf16>, vector<128x128xbf16>, vector<8x128xf32> -> vector<8x128xf32>
    %99 = arith.mulf %83, %83 : vector<8x128xf32>
    %cst_37 = arith.constant dense<0.000000e+00> : vector<8xf32>
    %100 = vector.multi_reduction <add>, %99, %cst_37 [1] : vector<8x128xf32> to vector<8xf32>
    %101 = vector.shape_cast %100 : vector<8xf32> to vector<8x1xf32>
    %cst_38 = arith.constant 9.99999993E-9 : f32
    %102 = vector.broadcast %cst_38 : f32 to vector<8x1xf32>
    %103 = arith.addf %101, %102 : vector<8x1xf32>
    %104 = math.rsqrt %103 : vector<8x1xf32>
    %105 = arith.mulf %95, %95 : vector<128x128xf32>
    %cst_39 = arith.constant dense<0.000000e+00> : vector<128xf32>
    %106 = vector.multi_reduction <add>, %105, %cst_39 [1] : vector<128x128xf32> to vector<128xf32>
    %107 = vector.shape_cast %106 : vector<128xf32> to vector<128x1xf32>
    %cst_40 = arith.constant 9.99999993E-9 : f32
    %108 = vector.broadcast %cst_40 : f32 to vector<128x1xf32>
    %109 = arith.addf %107, %108 : vector<128x1xf32>
    %110 = math.rsqrt %109 : vector<128x1xf32>
    %111 = vector.broadcast %104 : vector<8x1xf32> to vector<8x128xf32>
    %112 = arith.mulf %98, %111 : vector<8x128xf32>
    %113 = tpu.transpose %110, [1, 0] : vector<128x1xf32> -> vector<1x128xf32>
    %114 = vector.broadcast %113 : vector<1x128xf32> to vector<8x128xf32>
    %115 = arith.mulf %112, %114 : vector<8x128xf32>
    %c1_41 = arith.constant 1 : index
    %c0_42 = arith.constant 0 : index
    %c0_43 = arith.constant 0 : index
    %116 = vector.load %arg5[%c1_41, %c0_42, %c0_43] : memref<2x8x128xf32, #tpu.memory_space<vmem>>, vector<1x8x128xf32>
    %117 = vector.shape_cast %116 : vector<1x8x128xf32> to vector<8x128xf32>
    %118 = vector.shape_cast %115 : vector<8x128xf32> to vector<1x8x128xf32>
    tpu.vector_store %arg5[%c1_41, %c0_42, %c0_43], %118 {strides = array<i32>} : memref<2x8x128xf32, #tpu.memory_space<vmem>>, vector<1x8x128xf32>,
    return
  }
  func.func @transform_0(%arg0: i32, %arg1: memref<2x2xi32, #tpu.memory_space<smem>>) -> (i32, i32) {
    %c0_i32 = arith.constant 0 : i32
    %c0_i32_0 = arith.constant 0 : i32
    return %arg0, %c0_i32 : i32, i32
  }
  func.func @transform_1(%arg0: i32, %arg1: memref<2x2xi32, #tpu.memory_space<smem>>) -> (i32, i32) {
    %c0_i32 = arith.constant 0 : i32
    %c0_i32_0 = arith.constant 0 : i32
    %c0_i32_1 = arith.constant 0 : i32
    return %c0_i32, %c0_i32_0 : i32, i32
  }
  func.func @transform_2(%arg0: i32, %arg1: memref<2x2xi32, #tpu.memory_space<smem>>) -> (i32, i32) {
    %c0_i32 = arith.constant 0 : i32
    %c0_i32_0 = arith.constant 0 : i32
    %c0_i32_1 = arith.constant 0 : i32
    return %c0_i32, %c0_i32_0 : i32, i32
  }
  func.func @transform_3(%arg0: i32, %arg1: memref<2x2xi32, #tpu.memory_space<smem>>) -> (i32, i32, i32) {
    %c0_i32 = arith.constant 0 : i32
    %c0_i32_0 = arith.constant 0 : i32
    %c0_i32_1 = arith.constant 0 : i32
    return %arg0, %c0_i32, %c0_i32_0 : i32, i32, i32
  }
}

</mosaic_0001>

<bundles_post_ra>
// kernel: tpu_custom_call.1
= control target key start
LH: loop header
LB: loop body
LE: loop exit
PB: predicated region body
PF: predicated region fallthrough
CT: control target
= control target key end

     0   :  { %s1799_s15 = smov [#allocation4]   ;;  %s2377_s0 = inlined_call_operand.hbm [shape: s32[2,2], index: 0, kind: input, shape index: {}]   ;;  %s2378_s1 = inlined_call_operand.hbm [shape: bf16[32,768], index: 1, kind: input, shape index: {}]   ;;  %s2379_s2 = inlined_call_operand.hbm [shape: bf16[768,128], index: 2, kind: input, shape index: {}]   ;;  %s2380_s3 = inlined_call_operand.vmem [shape: f32[1,128], index: 3, kind: input, shape index: {}]   ;;  %s2381_s4 = inlined_call_operand.hbm [shape: f32[2,8,128], index: 4, kind: output, shape index: {}]  }
   0x1   :  { %10 = dma.hbm_to_smem %s2377_s0, 32, %s1799_s15, [#allocation3] }
   0x2   :  { %1791 = dma.done.wait [#allocation3], 32 }
   0x3   :  { %1792 = vsyncadd [#allocation3], 4294967264 }
   0x4   :  { %12 = sfence }
   0x5   :  { %13 = vsyncpa [#allocation6], 0 }
   0x6   :  { %14 = vsyncpa [#allocation9], 0 }
   0x7   :  { %15 = vsyncpa [#allocation7], 0  ;;  %s1800_s18 = smov [#allocation5]  }
   0x8   :  { %s21_s19 = sshll.u32 %s1800_s18, 4  ;;  %s22_s19 = int_to_ptr.vmem [resolvable:$true] %s21_s19 }
   0x9   :  { %s1739_s20 = scalar_lea.vmem %s22_s19, 1536  ;;  %p1744_p1 = scmp.lt.s32.totalorder %s22_s19, %s22_s19 }
   0xa   :  { %p1740_p0 = scmp.ne.s32.totalorder %s22_s19, %s1739_s20  ;;  %p1745_p2 = scmp.lt.s32.totalorder %s1739_s20, %s1739_s20 }
   0xc   :  { %p1746_p3 = por %p1745_p2, %p1744_p1 }
   0xe   :  { %p1747_p4 = pnand %p1746_p3, %p1740_p0 }
  0x10   :  { %1750 = shalt.err (!%p1747_p4)
}
  0x11   :  { %s1801_s21 = smov 384   ;;  %s1802_s22 = smov 24  }
  0x12   :  { %27 = dma.hbm_to_vmem [thread:$0]  %s2378_s1, 1536, %s22_s19, [#allocation6], %s1801_s21, %s1801_s21, %s1802_s22  }
  0x13   :  { %s1803_s24 = smov [#allocation8]  }
  0x14   :  { %s33_s25 = sshll.u32 %s1803_s24, 4  ;;  %s34_s25 = int_to_ptr.vmem [resolvable:$true] %s33_s25 }
  0x15   :  { %s1759_s26 = scalar_lea.vmem %s34_s25, 6144  ;;  %p1764_p6 = scmp.lt.s32.totalorder %s34_s25, %s34_s25 }
  0x16   :  { %p1760_p5 = scmp.ne.s32.totalorder %s34_s25, %s1759_s26  ;;  %p1765_p7 = scmp.lt.s32.totalorder %s1759_s26, %s1759_s26 }
  0x18   :  { %p1766_p8 = por %p1765_p7, %p1764_p6 }
  0x1a   :  { %p1767_p9 = pnand %p1766_p8, %p1760_p5 }
  0x1c   :  { %1770 = shalt.err (!%p1767_p9)
}
  0x1d   :  { %s1804_s27 = smov 64   ;;  %s1805_s28 = smov 4  }
  0x1e   :  { %39 = dma.hbm_to_vmem [thread:$0]  %s2379_s2, 6144, %s34_s25, [#allocation9], %s1804_s27, %s1804_s27, %s1805_s28  }
  0x1f   :  { %1793 = dma.done.wait [#allocation6], 1536  }
  0x20   :  { %1794 = vsyncadd [#allocation6], 4294965760 }
  0x21   :  { %1795 = dma.done.wait [#allocation9], 6144  }
  0x22   :  { %1796 = vsyncadd [#allocation9], 4294961152  ;;  %v1573_v0 = vld [vmem:[#allocation8 + $0x78] sm:$0xff]   ;;  %v1577_v4 = vld [vmem:[#allocation8 + $0x70] sm:$0xff]   ;;  %v1806_v60 = vmov 0.0   ;;  %vm1807_vm0 = vmmov 0  }
  0x23   :  { %v1574_v1 = vld [vmem:[#allocation8 + $0x38] sm:$0xff]   ;;  %1419 = vmatprep.subr.bf16.mxu0 %v1573_v0  ;;  %v1578_v5 = vld [vmem:[#allocation8 + $0x30] sm:$0xff]   ;;  %v1581_v8 = vld [vmem:[#allocation8 + $0x68] sm:$0xff]   ;;  %694 = vst [vmem:[#allocation2 + $0x20] sm:$0xff] %v1806_v60  ;;  %s1874_s5 = sld [smem:[#allocation4 + $0x1]]  ;;  %s1808_s12 = smov [#allocation10]  }
  0x24   :  { %v1575_v2 = vld [vmem:[#allocation8 + $0xf8] sm:$0xff]   ;;  %1420 = vmatpush3.bf16.msra.mxu0 %v1574_v1  ;;  %v1579_v6 = vld [vmem:[#allocation8 + $0xf0] sm:$0xff]   ;;  %v1582_v9 = vld [vmem:[#allocation8 + $0x28] sm:$0xff]   ;;  %695 = vst [vmem:[#allocation2 + $0x28] sm:$0xff] %v1806_v60  ;;  %s1362_s6 = sld [smem:[#allocation4 + $0x80]]  ;;  %s1282_s13 = sshll.u32 %s1808_s12, 4  ;;  %s1283_s13 = int_to_ptr.vmem [resolvable:$true] %s1282_s13 }
  0x25   :  { %v1576_v3 = vld [vmem:[#allocation8 + $0xb8] sm:$0xff]   ;;  %1447 = vmatprep.subr.bf16.mxu1 %v1575_v2  ;;  %1421 = vmatprep.subr.bf16.mxu0 %v1577_v4  ;;  %v1580_v7 = vld [vmem:[#allocation8 + $0xb0] sm:$0xff]   ;;  %v1583_v10 = vld [vmem:[#allocation8 + $0xe8] sm:$0xff]   ;;  %696 = vst [vmem:[#allocation2 + $0x30] sm:$0xff] %v1806_v60  ;;  %s1391_s8 = sld [smem:[#allocation4 + $0x81]]  ;;  %s1771_s14 = scalar_lea.vmem %s1283_s13, 256 }
  0x26   :  { %1448 = vmatpush3.bf16.msra.mxu1 %v1576_v3  ;;  %v1584_v11 = vld [vmem:[#allocation8 + $0xa8] sm:$0xff]   ;;  %v1585_v12 = vld [vmem:[#allocation8 + $0x60] sm:$0xff]   ;;  %v1589_v16 = vld [vmem:[#allocation8 + $0x58] sm:$0xff]   ;;  %697 = vst [vmem:[#allocation2 + $0x38] sm:$0xff] %v1806_v60  ;;  %p1772_p12 = scmp.ne.s32.totalorder %s1283_s13, %s1771_s14  ;;  %p1776_p13 = scmp.lt.s32.totalorder %s1283_s13, %s1283_s13 }
  0x27   :  { %1449 = vmatprep.subr.bf16.mxu1 %v1579_v6  ;;  %v1586_v13 = vld [vmem:[#allocation8 + $0x20] sm:$0xff]   ;;  %v1590_v17 = vld [vmem:[#allocation8 + $0x18] sm:$0xff]   ;;  %v1593_v20 = vld [vmem:[#allocation8 + $0x50] sm:$0xff]   ;;  %698 = vst [vmem:[#allocation2 + $0x40] sm:$0xff] %v1806_v60  ;;  %p1777_p0 = scmp.lt.s32.totalorder %s1771_s14, %s1771_s14 }
  0x28   :  { %1422 = vmatpush3.bf16.msra.mxu0 %v1578_v5  ;;  %v1587_v14 = vld [vmem:[#allocation8 + $0xe0] sm:$0xff]   ;;  %v1591_v18 = vld [vmem:[#allocation8 + $0xd8] sm:$0xff]   ;;  %v1594_v21 = vld [vmem:[#allocation8 + $0x10] sm:$0xff]   ;;  %699 = vst [vmem:[#allocation2 + $0x48] sm:$0xff] %v1806_v60 }
  0x29   :  { %1423 = vmatprep.subr.bf16.mxu0 %v1581_v8  ;;  %v1588_v15 = vld [vmem:[#allocation8 + $0xa0] sm:$0xff]   ;;  %v1592_v19 = vld [vmem:[#allocation8 + $0x98] sm:$0xff]   ;;  %v1595_v22 = vld [vmem:[#allocation8 + $0xd0] sm:$0xff]   ;;  %700 = vst [vmem:[#allocation2 + $0x50] sm:$0xff] %v1806_v60  ;;  %s1018_s9 = sadd.s32 17, %s1874_s5  ;;  %p1778_p1 = por %p1777_p0, %p1776_p13 }
  0x2a   :  { %1450 = vmatpush3.bf16.msra.mxu1 %v1580_v7  ;;  %v1596_v23 = vld [vmem:[#allocation8 + $0x90] sm:$0xff]   ;;  %v1597_v24 = vld [vmem:[#allocation8 + $0x48] sm:$0xff]   ;;  %v1601_v28 = vld [vmem:[#allocation8 + $0x40] sm:$0xff]   ;;  %701 = vst [vmem:[#allocation2 + $0x58] sm:$0xff] %v1806_v60  ;;  %p1019_p11 = scmp.lt.s32.totalorder %s1018_s9, 40 }
  0x2b   :  { %1451 = vmatprep.subr.bf16.mxu1 %v1583_v10  ;;  %v1598_v25 = vld [vmem:[#allocation8 + $0x8] sm:$0xff]   ;;  %v1602_v29 = vld [vmem:[#allocation8] sm:$0xff]   ;;  %v1608_v34 = vld [vmem:[#allocation8 + $0x178] sm:$0xff]   ;;  %702 = vst [vmem:[#allocation2 + $0x60] sm:$0xff] %v1806_v60  ;;  %p1779_p2 = pnand %p1778_p1, %p1772_p12 }
  0x2c   :  { %1424 = vmatpush3.bf16.msra.mxu0 %v1582_v9  ;;  %v1599_v26 = vld [vmem:[#allocation8 + $0xc8] sm:$0xff]   ;;  %v1603_v30 = vld [vmem:[#allocation8 + $0xc0] sm:$0xff]   ;;  %v1612_v37 = vld [vmem:[#allocation8 + $0x138] sm:$0xff]   ;;  %703 = vst [vmem:[#allocation2 + $0x68] sm:$0xff] %v1806_v60  ;;  %s2419_s9 = smov (!%p1019_p11, %s1018_s9), 40 }
  0x2d   :  { %1425 = vmatprep.subr.bf16.mxu0 %v1585_v12  ;;  %v1600_v27 = vld [vmem:[#allocation8 + $0x88] sm:$0xff]   ;;  %v1604_v31 = vld [vmem:[#allocation5] ss:$24 sps:$4 sm:$0xff]   ;;  %v1606_v32 = vld [vmem:[#allocation5 + $0x4] ss:$24 sps:$4 sm:$0xff]   ;;  %704 = vst [vmem:[#allocation2 + $0x70] sm:$0xff] %v1806_v60 }
  0x2e   :  { %1452 = vmatpush3.bf16.msra.mxu1 %v1584_v11  ;;  %v1607_v33 = vld [vmem:[#allocation8 + $0x80] sm:$0xff]   ;;  %544 = vmatprep.mubr.bf16.mxu0 %v1606_v32  ;;  %v1613_v38 = vld [vmem:[#allocation8 + $0x170] sm:$0xff]   ;;  %v1615_v40 = vld [vmem:[#allocation8 + $0x168] sm:$0xff]   ;;  %705 = vst [vmem:[#allocation2 + $0x78] sm:$0xff] %v1806_v60  ;;  %s1964_s11 = scalar_lea.vmem [#allocation2], %s2419_s9 }
  0x2f   :  { %1453 = vmatprep.subr.bf16.mxu1 %v1587_v14  ;;  %v1609_v35 = vld [vmem:[#allocation5 + $0x8] ss:$24 sps:$4 sm:$0xff]   ;;  %v1611_v36 = vld [vmem:[#allocation5 + $0xc] ss:$24 sps:$4 sm:$0xff]   ;;  %v1614_v39 = vld [vmem:[#allocation8 + $0x130] sm:$0xff]   ;;  %706 = vst [vmem:[#allocation2 + $0x80] sm:$0xff] %v1806_v60 }
  0x30   :  { %1426 = vmatpush3.bf16.msra.mxu0 %v1586_v13  ;;  %593 = vmatprep.mubr.bf16.mxu1 %v1611_v36  ;;  %v1616_v41 = vld [vmem:[#allocation8 + $0x128] sm:$0xff]   ;;  %v1617_v42 = vld [vmem:[#allocation8 + $0x160] sm:$0xff]   ;;  %v1619_v45 = vld [vmem:[#allocation8 + $0x158] sm:$0xff]   ;;  %707 = vst [vmem:[#allocation2 + $0x88] sm:$0xff] %v1806_v60 }
  0x31   :  { %1427 = vmatprep.subr.bf16.mxu0 %v1589_v16  ;;  %v1618_v43 = vld [vmem:[#allocation8 + $0x120] sm:$0xff]   ;;  %v1620_v44 = vld [vmem:[#allocation5 + $0x34] ss:$24 sps:$4 sm:$0xff]   ;;  %v1623_v46 = vld [vmem:[#allocation5 + $0x30] ss:$24 sps:$4 sm:$0xff]   ;;  %708 = vst [vmem:[#allocation2 + $0x90] sm:$0xff] %v1806_v60 }
  0x32   :  { %1454 = vmatpush3.bf16.msra.mxu1 %v1588_v15  ;;  %v1624_v47 = vld [vmem:[#allocation5 + $0x3c] ss:$24 sps:$4 sm:$0xff]   ;;  %v1626_v48 = vld [vmem:[#allocation5 + $0x38] ss:$24 sps:$4 sm:$0xff]   ;;  %v1629_v53 = vld [vmem:[#allocation8 + $0x148] sm:$0xff]   ;;  %709 = vst [vmem:[#allocation2 + $0x98] sm:$0xff] %v1806_v60 }
  0x33   :  { %1455 = vmatprep.subr.bf16.mxu1 %v1591_v18  ;;  %v1622_v49 = vld [vmem:[#allocation8 + $0x118] sm:$0xff]   ;;  %v1627_v50 = vld [vmem:[#allocation8 + $0x150] sm:$0xff]   ;;  %v1630_v54 = vld [vmem:[#allocation8 + $0x108] sm:$0xff]   ;;  %710 = vst [vmem:[#allocation2 + $0xa0] sm:$0xff] %v1806_v60 }
  0x34   :  { %1428 = vmatpush3.bf16.msra.mxu0 %v1590_v17  ;;  %v1628_v51 = vld [vmem:[#allocation8 + $0x110] sm:$0xff]   ;;  %v1631_v55 = vld [vmem:[#allocation8 + $0x140] sm:$0xff]   ;;  %v1297_v9 = vld [vmem:[%s2380_s3] ss:$0 sm:$0xff]  ;;  %s1869_s3 = sld [smem:[#allocation4]] }
  0x35   :  { %1429 = vmatprep.subr.bf16.mxu0 %v1593_v20  ;;  %v1635_v52 = vld [vmem:[#allocation5 + $0x14] ss:$24 sps:$4 sm:$0xff]   ;;  %v1632_v56 = vld [vmem:[#allocation8 + $0x100] sm:$0xff]   ;;  %v1633_v57 = vld [vmem:[#allocation5 + $0x10] ss:$24 sps:$4 sm:$0xff]  }
  0x36   :  { %1456 = vmatpush3.bf16.msra.mxu1 %v1592_v19  ;;  %v1636_v58 = vld [vmem:[#allocation5 + $0x44] ss:$24 sps:$4 sm:$0xff]   ;;  %v1638_v59 = vld [vmem:[#allocation5 + $0x40] ss:$24 sps:$4 sm:$0xff]  }
  0x37   :  { %1457 = vmatprep.subr.bf16.mxu1 %v1595_v22 }
  0x38   :  { %1430 = vmatpush3.bf16.msra.mxu0 %v1594_v21 }
  0x39   :  { %1431 = vmatprep.subr.bf16.mxu0 %v1597_v24 }
  0x3a   :  { %1458 = vmatpush3.bf16.msra.mxu1 %v1596_v23  ;;  %s729_s7 = sadd.s32 1, %s1869_s3 }
  0x3b   :  { %1459 = vmatprep.subr.bf16.mxu1 %v1599_v26  ;;  %p730_p10 = scmp.lt.s32.totalorder %s729_s7, 40 }
  0x3c   :  { %1432 = vmatpush3.bf16.msra.mxu0 %v1598_v25 }
  0x3d   :  { %1433 = vmatprep.subr.bf16.mxu0 %v1601_v28  ;;  %s2417_s7 = smov (!%p730_p10, %s729_s7), 40 }
  0x3e   :  { %1460 = vmatpush3.bf16.msra.mxu1 %v1600_v27  ;;  %s1956_s10 = scalar_lea.vmem [#allocation2], %s2417_s7 }
  0x3f   :  { %1461 = vmatprep.subr.bf16.mxu1 %v1603_v30 }
  0x40   :  { %1434 = vmatpush3.bf16.msra.mxu0 %v1602_v29 }
  0x41   :  { %1475 = vmatprep.subr.bf16.mxu0 %v1608_v34 }
  0x42   :  { %1462 = vmatpush3.bf16.msra.mxu1 %v1607_v33 }
  0x43   :  { %545 = vmatmul.mubr.bf16.vlgmr.msra.gmra.mxu0 %v1604_v31  ;;  %1521 = vmatprep.subr.bf16.mxu1 %v1806_v60 }
  0x44   :  { %1476 = vmatpush3.bf16.msra.mxu0 %v1612_v37  ;;  %552 = vmatprep.mubr.bf16.mxu0 %v1620_v44 }
  0x45   :  { %594 = vmatmul.mubr.bf16.vlgmr.msra.gmra.mxu1 %v1609_v35  ;;  %1477 = vmatprep.subr.bf16.mxu0 %v1613_v38 }
  0x46   :  { %601 = vmatprep.mubr.bf16.mxu1 %v1624_v47 }
  0x48   :  { %1478 = vmatpush3.bf16.msra.mxu0 %v1614_v39 }
  0x49   :  { %1479 = vmatprep.subr.bf16.mxu0 %v1615_v40 }
  0x4b   :  { %553 = vmatmul.mubr.bf16.gmra.mxu0 %v1623_v46 }
  0x4c   :  { %1480 = vmatpush3.bf16.msra.mxu0 %v1616_v41  ;;  %642 = vmatprep.mubr.bf16.mxu0 %v1635_v52 }
  0x4d   :  { %1481 = vmatprep.subr.bf16.mxu0 %v1617_v42  ;;  %602 = vmatmul.mubr.bf16.gmra.mxu1 %v1626_v48 }
  0x4e   :  { %1537 = vmatprep.mubr.msk.bf16.mxu1 %vm1807_vm0, %v1806_v60 }
  0x50   :  { %1482 = vmatpush3.bf16.msra.mxu0 %v1618_v43 }
  0x51   :  { %1483 = vmatprep.subr.bf16.mxu0 %v1619_v45 }
  0x54   :  { %1484 = vmatpush3.bf16.msra.mxu0 %v1622_v49 }
  0x55   :  { %1485 = vmatprep.subr.bf16.mxu0 %v1627_v50 }
  0x58   :  { %1486 = vmatpush3.bf16.msra.mxu0 %v1628_v51 }
  0x59   :  { %1487 = vmatprep.subr.bf16.mxu0 %v1629_v53 }
  0x5c   :  { %1488 = vmatpush3.bf16.msra.mxu0 %v1630_v54  ;;  %v683_v54 = vlaneseq }
  0x5d   :  { %1489 = vmatprep.subr.bf16.mxu0 %v1631_v55 }
  0x60   :  { %1490 = vmatpush3.bf16.msra.mxu0 %v1632_v56 }
  0x61   :  { %1541 = vmatprep.subr.bf16.mxu0 %v1806_v60 }
  0x63   :  { %643 = vmatmul.mubr.bf16.vlgmr.msra.gmra.mxu0 %v1633_v57  ;;  %v684_v57 = vand.u32 127, %v683_v54 }
  0x64   :  { %650 = vmatprep.mubr.bf16.mxu0 %v1636_v58  ;;  %v1871_v58 = vshrl.u32 %v683_v54, 7 }
  0x65   :  { %vm685_vm1 = vcmp.lt.s32.totalorder %v684_v57, 100 }
  0x6b   :  { %651 = vmatmul.mubr.bf16.gmra.mxu0 %v1638_v59 }
  0x6c   :  { %1557 = vmatprep.mubr.msk.bf16.mxu0 %vm1807_vm0, %v1806_v60 }
 0x103   :  { %v1435_v61 = vpop.f32.mrf.mxu0 }
 0x105   :  { %v1436_v62 = vpop.f32.mrf.mxu0  ;;  %v1463_v0 = vpop.f32.mrf.mxu1 }
 0x106   :  { %v1437_v8 = vadd.f32 %v1436_v62, %v1435_v61  ;;  %v724_v61 = vstv %s1869_s3 }
 0x107   :  { %v1438_v63 = vpop.f32.mrf.mxu0  ;;  %v1464_v2 = vpop.f32.mrf.mxu1  ;;  %vm1877_vm2 = vcmp.lt.s32.totalorder %v1871_v58, %v724_v61  ;;  %v2098_v61 = vadd.s32 72, %v1871_v58 }
 0x108   :  { %v547_v12 = vadd.f32 %v1437_v8, %v1297_v9  ;;  %v1465_v13 = vadd.f32 %v1464_v2, %v1463_v0 }
 0x109   :  { %v1439_v1 = vpop.f32.mrf.mxu0  ;;  %v1466_v4 = vpop.f32.mrf.mxu1 }
 0x10a   :  { %v1440_v14 = vadd.f32 %v1439_v1, %v1438_v63  ;;  %v596_v19 = vadd.f32 %v1465_v13, %v547_v12  ;;  %v1905_v13 = vadd.s32 112, %v1871_v58 }
 0x10b   :  { %v1441_v3 = vpop.f32.mrf.mxu0  ;;  %v1467_v6 = vpop.f32.mrf.mxu1 }
 0x10c   :  { %v550_v20 = vadd.f32 %v1440_v14, %v1297_v9  ;;  %v1468_v21 = vadd.f32 %v1467_v6, %v1466_v4  ;;  %v1908_v14 = vadd.s32 120, %v1871_v58 }
 0x10d   :  { %v1442_v5 = vpop.f32.mrf.mxu0  ;;  %v1469_v10 = vpop.f32.mrf.mxu1 }
 0x10e   :  { %v1443_v17 = vadd.f32 %v1442_v5, %v1441_v3  ;;  %v599_v29 = vadd.f32 %v1468_v21, %v550_v20  ;;  %v1013_v5 = vstv %s1874_s5  ;;  %v1930_v20 = vadd.s32 24, %v1871_v58 }
 0x10f   :  { %v1444_v7 = vpop.f32.mrf.mxu0  ;;  %v1470_v15 = vpop.f32.mrf.mxu1  ;;  %vm1892_vm3 = vcmp.lt.s32.totalorder %v1871_v58, %v1013_v5 }
 0x110   :  { %v555_v26 = vadd.f32 %v1443_v17, %v1297_v9  ;;  %v1471_v27 = vadd.f32 %v1470_v15, %v1469_v10  ;;  %v1913_v17 = vstv %s1391_s8 }
 0x111   :  { %v1445_v11 = vpop.f32.mrf.mxu0  ;;  %v1472_v23 = vpop.f32.mrf.mxu1  ;;  %vm2383_vm6 = vcmp.lt.s32.totalorder %v1905_v13, %v1913_v17  ;;  %vm2382_vm7 = vcmp.lt.s32.totalorder %v1908_v14, %v1913_v17 }
 0x112   :  { %v1446_v30 = vadd.f32 %v1445_v11, %v1444_v7  ;;  %v604_v36 = vadd.f32 %v1471_v27, %v555_v26  ;;  %vm1948_vm9 = vmpackc.low %vm2382_vm7, %vm2383_vm6 }
 0x113   :  { %v1473_v33 = vpop.f32.mrf.mxu1 }
 0x114   :  { %v558_v38 = vadd.f32 %v1446_v30, %v1297_v9  ;;  %v1474_v39 = vadd.f32 %v1473_v33, %v1472_v23  ;;  %v1985_v30 = vadd.s32 32, %v1871_v58 }
 0x116   :  { %v607_v45 = vadd.f32 %v1474_v39, %v558_v38 }
 0x123   :  { %v1491_v16 = vpop.f32.mrf.mxu0 }
 0x125   :  { %v1492_v18 = vpop.f32.mrf.mxu0 }
 0x126   :  { %v1493_v22 = vadd.f32 %v1492_v18, %v1491_v16  ;;  %v1911_v16 = vstv %s1362_s6  ;;  %v1920_v18 = vadd.s32 8, %v1871_v58 }
 0x127   :  { %v1494_v24 = vpop.f32.mrf.mxu0  ;;  %vm779_vm4 = vcmp.lt.s32.totalorder %v1905_v13, %v1911_v16  ;;  %vm780_vm5 = vcmp.lt.s32.totalorder %v1908_v14, %v1911_v16  ;;  %vm2385_vm10 = vcmp.lt.s32.totalorder %v1871_v58, %v1911_v16  ;;  %vm2388_vm13 = vcmp.lt.s32.totalorder %v1930_v20, %v1911_v16 }
 0x128   :  { %v645_v25 = vadd.f32 %v1493_v22, %v596_v19  ;;  %v1927_v19 = vadd.s32 16, %v1871_v58  ;;  %vm1938_vm8 = vmpackc.low %vm780_vm5, %vm779_vm4  ;;  %vm2384_vm11 = vcmp.lt.s32.totalorder %v1920_v18, %v1911_v16  ;;  %vm2391_vm14 = vcmp.lt.s32.totalorder %v1985_v30, %v1911_v16 }
 0x129   :  { %v1495_v28 = vpop.f32.mrf.mxu0 }
 0x12a   :  { %v1358_v31 = vmul.f32 -1.442695, %v645_v25  ;;  %v1496_v32 = vadd.f32 %v1495_v28, %v1494_v24  ;;  %vm2389_vm12 = vcmp.lt.s32.totalorder %v1927_v19, %v1911_v16 }
 0x12b   :  { %v1497_v34 = vpop.f32.mrf.mxu0 }
 0x12c   :  { %1639 = vpow2.f32 %v1358_v31  ;;  %v648_v35 = vadd.f32 %v1496_v32, %v599_v29  ;;  %v1988_v31 = vadd.s32 40, %v1871_v58 }
 0x12d   :  { %v1498_v37 = vpop.f32.mrf.mxu0 }
 0x12e   :  { %v1359_v40 = vmul.f32 -1.442695, %v648_v35  ;;  %v1499_v41 = vadd.f32 %v1498_v37, %v1497_v34  ;;  %v2007_v37 = vadd.s32 96, %v1871_v58  ;;  %vm2390_vm15 = vcmp.lt.s32.totalorder %v1988_v31, %v1911_v16 }
 0x12f   :  { %v1500_v42 = vpop.f32.mrf.mxu0 }
 0x130   :  { %1641 = vpow2.f32 %v1359_v40  ;;  %v653_v43 = vadd.f32 %v1499_v41, %v604_v36  ;;  %v2012_v40 = vadd.s32 104, %v1871_v58  ;;  %vm777_vm0 = vcmp.lt.s32.totalorder %v2007_v37, %v1911_v16 }
 0x131   :  { %v1501_v44 = vpop.f32.mrf.mxu0 }
 0x132   :  { %v1360_v46 = vmul.f32 -1.442695, %v653_v43  ;;  %v1502_v47 = vadd.f32 %v1501_v44, %v1500_v42  ;;  %v2026_v43 = vadd.s32 48, %v1871_v58  ;;  %vm2386_vm7 = vcmp.lt.s32.totalorder %v2012_v40, %v1913_v17 }
 0x134   :  { %1643 = vpow2.f32 %v1360_v46  ;;  %v656_v48 = vadd.f32 %v1502_v47, %v607_v45  ;;  %v2039_v46 = vadd.s32 56, %v1871_v58  ;;  %vm771_vm6 = vcmp.lt.s32.totalorder %v2026_v43, %v1911_v16 }
 0x136   :  { %v1361_v49 = vmul.f32 -1.442695, %v656_v48 }
 0x138   :  { %1645 = vpow2.f32 %v1361_v49 }
 0x139   :  { %v1640_v50 = vpop.eup %1639 }
 0x13a   :  { %v671_v51 = vadd.f32 1.0, %v1640_v50 }
 0x13c   :  { %1647 = vrcp.f32 %v671_v51 }
 0x13d   :  { %v1642_v52 = vpop.eup %1641 }
 0x13e   :  { %v672_v53 = vadd.f32 1.0, %v1642_v52 }
 0x140   :  { %1649 = vrcp.f32 %v672_v53 }
 0x141   :  { %v1644_v55 = vpop.eup %1643 }
 0x142   :  { %v673_v56 = vadd.f32 1.0, %v1644_v55 }
 0x144   :  { %1651 = vrcp.f32 %v673_v56 }
 0x145   :  { %v1646_v59 = vpop.eup %1645 }
 0x146   :  { %v674_v62 = vadd.f32 1.0, %v1646_v59  ;;  %v2095_v59 = vadd.s32 64, %v1871_v58 }
 0x148   :  { %1653 = vrcp.f32 %v674_v62 }
 0x149   :  { %v1648_v0 = vpop.eup %1647 }
 0x14a   :  { %v1882_v1 = vsel %vm685_vm1, %v1648_v0, 0.0 }
 0x14b   :  { %690 = vst [vmem:[#allocation2] sm:$0xff] %v1882_v1  ;;  %v728_v2 = vsel %vm1877_vm2, %v1882_v1, 0.0 }
 0x14c   :  { %v878_v3 = vmul.f32 %v728_v2, %v728_v2 }
 0x14d   :  { %v1650_v4 = vpop.eup %1649 }
 0x14e   :  { %v687_v6 = vsel %vm685_vm1, %v1650_v4, 0.0  ;;  %879 = vadd.xlane.f32.xlu0 %v878_v3  ;;  %v2103_v3 = vadd.s32 80, %v1871_v58  ;;  %v2106_v4 = vadd.s32 88, %v1871_v58 }
 0x14f   :  { %691 = vst [vmem:[#allocation2 + $0x8] sm:$0xff] %v687_v6 }
 0x151   :  { %v1652_v8 = vpop.eup %1651 }
 0x152   :  { %v1898_v9 = vsel %vm685_vm1, %v1652_v8, 0.0 }
 0x153   :  { %692 = vst [vmem:[#allocation2 + $0x10] sm:$0xff] %v1898_v9  ;;  %v1017_v10 = vsel %vm1892_vm3, %v1898_v9, 0.0 }
 0x154   :  { %v1152_v11 = vmul.f32 %v1017_v10, %v1017_v10 }
 0x155   :  { %v1654_v12 = vpop.eup %1653 }
 0x156   :  { %v689_v15 = vsel %vm685_vm1, %v1654_v12, 0.0  ;;  %1153 = vadd.xlane.f32.xlu0 %v1152_v11  ;;  %vm778_vm1 = vcmp.lt.s32.totalorder %v2012_v40, %v1911_v16 }
 0x157   :  { %693 = vst [vmem:[#allocation2 + $0x18] sm:$0xff] %v689_v15 }
 0x15e   :  { %v1959_v23 = vld [vmem:[%s1956_s10 + $0x70] sm:$0xff]  ;;  %v1962_v24 = vld [vmem:[%s1956_s10 + $0x78] sm:$0xff]  ;;  %v1977_v28 = vld [vmem:[%s1956_s10 + $0x8] sm:$0xff] }
 0x15f   :  { %v1967_v25 = vld [vmem:[%s1964_s11 + $0x70] sm:$0xff]  ;;  %v1364_v26 = vpack.c.bf16 %v1962_v24, %v1959_v23  ;;  %v1974_v27 = vld [vmem:[%s1964_s11 + $0x78] sm:$0xff]  ;;  %v1980_v29 = vld [vmem:[%s1956_s10] sm:$0xff]  ;;  %v814_v33 = vsel %vm2384_vm11, %v1977_v28, 0.0 }
 0x160   :  { %v1393_v32 = vpack.c.bf16 %v1974_v27, %v1967_v25  ;;  %v813_v34 = vsel %vm2385_vm10, %v1980_v29, 0.0  ;;  %v2001_v35 = vld [vmem:[%s1956_s10 + $0x10] sm:$0xff]  ;;  %v2004_v36 = vld [vmem:[%s1956_s10 + $0x18] sm:$0xff]  ;;  %v884_v38 = vmul.f32 %v814_v33, %v814_v33  ;;  %v2029_v44 = vld [vmem:[%s1956_s10 + $0x20] sm:$0xff]  ;;  %vm772_vm10 = vcmp.lt.s32.totalorder %v2039_v46, %v1911_v16 }
 0x161   :  { %1522 = vmatpush3.bf16.xpose.msk.msra.mxu1 %vm1938_vm8, %v1364_v26  ;;  %v883_v39 = vmul.f32 %v813_v34, %v813_v34  ;;  %v815_v41 = vsel %vm2389_vm12, %v2001_v35, 0.0  ;;  %v816_v42 = vsel %vm2388_vm13, %v2004_v36, 0.0  ;;  %v2034_v45 = vld [vmem:[%s1956_s10 + $0x28] sm:$0xff]  ;;  %v2043_v47 = vld [vmem:[%s1956_s10 + $0x60] sm:$0xff]  ;;  %vm2387_vm8 = vcmp.lt.s32.totalorder %v2007_v37, %v1913_v17  ;;  %v2087_v56 = vld [vmem:[%s1956_s10 + $0x30] sm:$0xff] }
 0x162   :  { %1542 = vmatpush3.bf16.xpose.msk.msra.mxu0 %vm1948_vm9, %v1393_v32  ;;  %1523 = vmatprep.subr.bf16.mxu1 %v1806_v60  ;;  %v2046_v48 = vld [vmem:[%s1956_s10 + $0x68] sm:$0xff]  ;;  %v885_v49 = vmul.f32 %v815_v41, %v815_v41  ;;  %v886_v50 = vmul.f32 %v816_v42, %v816_v42  ;;  %v2053_v51 = vld [vmem:[%s1964_s11 + $0x60] sm:$0xff]  ;;  %vm1366_vm9 = vmpackc.low %vm778_vm1, %vm777_vm0  ;;  %v817_v53 = vsel %vm2391_vm14, %v2029_v44, 0.0  ;;  %v818_v54 = vsel %vm2390_vm15, %v2034_v45, 0.0 }
 0x163   :  { %901 = vadd.xlane.f32.xlu1 %v884_v38  ;;  %899 = vadd.xlane.f32.xlu0 %v883_v39  ;;  %v2056_v52 = vld [vmem:[%s1964_s11 + $0x68] sm:$0xff]  ;;  %v1367_v55 = vpack.c.bf16 %v2046_v48, %v2043_v47  ;;  %vm1395_vm11 = vmpackc.low %vm2386_vm7, %vm2387_vm8  ;;  %v2090_v57 = vld [vmem:[%s1956_s10 + $0x38] sm:$0xff]  ;;  %v887_v0 = vmul.f32 %v817_v53, %v817_v53  ;;  %v888_v2 = vmul.f32 %v818_v54, %v818_v54  ;;  %v819_v5 = vsel %vm771_vm6, %v2087_v56, 0.0 }
 0x164   :  { %1543 = vmatprep.subr.bf16.mxu0 %v1806_v60  ;;  %v1396_v62 = vpack.c.bf16 %v2056_v52, %v2053_v51  ;;  %v820_v6 = vsel %vm772_vm10, %v2090_v57, 0.0  ;;  %v741_v8 = vld [vmem:[%s1956_s10 + $0x40] sm:$0xff]  ;;  %v742_v10 = vld [vmem:[%s1956_s10 + $0x48] sm:$0xff]  ;;  %v743_v11 = vld [vmem:[%s1956_s10 + $0x50] sm:$0xff]  ;;  %v889_v15 = vmul.f32 %v819_v5, %v819_v5  ;;  %vm775_vm7 = vcmp.lt.s32.totalorder %v2103_v3, %v1911_v16 }
 0x165   :  { %v744_v12 = vld [vmem:[%s1956_s10 + $0x58] sm:$0xff]  ;;  %v890_v21 = vmul.f32 %v820_v6, %v820_v6  ;;  %vm776_vm8 = vcmp.lt.s32.totalorder %v2106_v4, %v1911_v16  ;;  %v2131_v22 = vld [vmem:[%s1964_s11 + $0x50] sm:$0xff]  ;;  %vm2393_vm12 = vcmp.lt.s32.totalorder %v2103_v3, %v1913_v17  ;;  %vm2392_vm15 = vcmp.lt.s32.totalorder %v2106_v4, %v1913_v17  ;;  %v2169_v54 = vld [vmem:[%s1964_s11 + $0x40] sm:$0xff] }
 0x166   :  { %v2134_v26 = vld [vmem:[%s1964_s11 + $0x58] sm:$0xff]  ;;  %vm1369_vm13 = vmpackc.low %vm776_vm8, %vm775_vm7  ;;  %v1370_v34 = vpack.c.bf16 %v744_v12, %v743_v11  ;;  %v823_v42 = vsel %vm775_vm7, %v743_v11, 0.0 }
 0x167   :  { %903 = vadd.xlane.f32.xlu1 %v885_v49  ;;  %905 = vadd.xlane.f32.xlu0 %v886_v50  ;;  %vm1398_vm14 = vmpackc.low %vm2392_vm15, %vm2393_vm12  ;;  %v1399_v38 = vpack.c.bf16 %v2134_v26, %v2131_v22  ;;  %v824_v49 = vsel %vm776_vm8, %v744_v12, 0.0  ;;  %v893_v50 = vmul.f32 %v823_v42, %v823_v42  ;;  %vm2405_vm15 = vcmp.lt.s32.totalorder %v1927_v19, %v1911_v16 }
 0x168   :  { %v894_v53 = vmul.f32 %v824_v49, %v824_v49  ;;  %v1379_v49 = vpack.c.bf16 %v2034_v45, %v2029_v44  ;;  %vm2406_vm12 = vcmp.lt.s32.totalorder %v1930_v20, %v1911_v16 }
 0x169   :  { %1524 = vmatpush3.bf16.xpose.msk.msra.mxu1 %vm1366_vm9, %v1367_v55  ;;  %vm774_vm9 = vcmp.lt.s32.totalorder %v2098_v61, %v1911_v16  ;;  %v2172_v55 = vld [vmem:[%s1964_s11 + $0x48] sm:$0xff] }
 0x16a   :  { %1544 = vmatpush3.bf16.xpose.msk.msra.mxu0 %vm1395_vm11, %v1396_v62  ;;  %1525 = vmatprep.subr.bf16.mxu1 %v1806_v60  ;;  %vm773_vm11 = vcmp.lt.s32.totalorder %v2095_v59, %v1911_v16  ;;  %v822_v33 = vsel %vm774_vm9, %v742_v10, 0.0  ;;  %v825_v62 = vsel %vm777_vm0, %v2043_v47, 0.0  ;;  %v1402_v47 = vpack.c.bf16 %v2172_v55, %v2169_v54 }
 0x16b   :  { %907 = vadd.xlane.f32.xlu1 %v887_v0  ;;  %909 = vadd.xlane.f32.xlu0 %v888_v2  ;;  %v821_v32 = vsel %vm773_vm11, %v741_v8, 0.0  ;;  %v892_v41 = vmul.f32 %v822_v33, %v822_v33  ;;  %vm1372_vm7 = vmpackc.low %vm774_vm9, %vm773_vm11  ;;  %v826_v0 = vsel %vm778_vm1, %v2046_v48, 0.0  ;;  %v1373_v2 = vpack.c.bf16 %v742_v10, %v741_v8  ;;  %v2210_v10 = vld [vmem:[%s1964_s11] sm:$0xff] }
 0x16c   :  { %1545 = vmatprep.subr.bf16.mxu0 %v1806_v60  ;;  %v891_v39 = vmul.f32 %v821_v32, %v821_v32  ;;  %v895_v5 = vmul.f32 %v825_v62, %v825_v62  ;;  %v896_v6 = vmul.f32 %v826_v0, %v826_v0  ;;  %v827_v48 = vsel %vm779_vm4, %v1959_v23, 0.0  ;;  %v1028_v23 = vld [vmem:[%s1964_s11 + $0x30] sm:$0xff]  ;;  %vm1375_vm4 = vmpackc.low %vm772_vm10, %vm771_vm6  ;;  %v1023_v32 = vld [vmem:[%s1964_s11 + $0x8] sm:$0xff] }
 0x16d   :  { %v828_v8 = vsel %vm780_vm5, %v1962_v24, 0.0  ;;  %vm1039_vm0 = vcmp.lt.s32.totalorder %v1871_v58, %v1913_v17  ;;  %v897_v11 = vmul.f32 %v827_v48, %v827_v48  ;;  %vm1045_vm5 = vcmp.lt.s32.totalorder %v2026_v43, %v1913_v17 }
 0x16e   :  { %v898_v12 = vmul.f32 %v828_v8, %v828_v8  ;;  %vm1046_vm1 = vcmp.lt.s32.totalorder %v2039_v46, %v1913_v17  ;;  %v1087_v24 = vsel %vm1039_vm0, %v2210_v10, 0.0  ;;  %vm1040_vm10 = vcmp.lt.s32.totalorder %v1920_v18, %v1913_v17 }
 0x16f   :  { %911 = vadd.xlane.f32.xlu1 %v889_v15  ;;  %913 = vadd.xlane.f32.xlu0 %v890_v21  ;;  %v2217_v15 = vld [vmem:[%s1964_s11 + $0x38] sm:$0xff]  ;;  %v1376_v21 = vpack.c.bf16 %v2090_v57, %v2087_v56  ;;  %vm1404_vm6 = vmpackc.low %vm1046_vm1, %vm1045_vm5  ;;  %v1088_v56 = vsel %vm1040_vm10, %v1023_v32, 0.0  ;;  %v1024_v57 = vld [vmem:[%s1964_s11 + $0x10] sm:$0xff]  ;;  %vm1041_vm11 = vcmp.lt.s32.totalorder %v1927_v19, %v1913_v17  ;;  %vm2403_vm9 = vcmp.lt.s32.totalorder %v1985_v30, %v1911_v16 }
 0x170   :  { %v1405_v33 = vpack.c.bf16 %v2217_v15, %v1028_v23  ;;  %v1089_v42 = vsel %vm1041_vm11, %v1024_v57, 0.0  ;;  %v1093_v19 = vsel %vm1045_vm5, %v1028_v23, 0.0  ;;  %vm1387_vm5 = vmpackc.low %vm1877_vm2, %vm1877_vm2  ;;  %vm2409_vm2 = vcmp.lt.s32.totalorder %v2098_v61, %v1913_v17 }
 0x171   :  { %1526 = vmatpush3.bf16.xpose.msk.msra.mxu1 %vm1369_vm13, %v1370_v34  ;;  %vm1047_vm13 = vcmp.lt.s32.totalorder %v2095_v59, %v1913_v17  ;;  %v1157_v34 = vmul.f32 %v1087_v24, %v1087_v24  ;;  %v1159_v62 = vmul.f32 %v1089_v42, %v1089_v42 }
 0x172   :  { %1546 = vmatpush3.bf16.xpose.msk.msra.mxu0 %vm1398_vm14, %v1399_v38  ;;  %1527 = vmatprep.subr.bf16.mxu1 %v1806_v60  ;;  %vm2394_vm14 = vcmp.lt.s32.totalorder %v2098_v61, %v1913_v17  ;;  %v1158_v38 = vmul.f32 %v1088_v56, %v1088_v56 }
 0x173   :  { %915 = vadd.xlane.f32.xlu1 %v891_v39  ;;  %917 = vadd.xlane.f32.xlu0 %v892_v41  ;;  %vm1401_vm8 = vmpackc.low %vm2394_vm14, %vm1047_vm13  ;;  %v1026_v39 = vld [vmem:[%s1964_s11 + $0x20] sm:$0xff]  ;;  %v1027_v41 = vld [vmem:[%s1964_s11 + $0x28] sm:$0xff] }
 0x174   :  { %1547 = vmatprep.subr.bf16.mxu0 %v1806_v60  ;;  %vm1381_vm14 = vmpackc.low %vm2406_vm12, %vm2405_vm15  ;;  %vm2407_vm12 = vcmp.lt.s32.totalorder %v1871_v58, %v1911_v16  ;;  %vm2408_vm15 = vcmp.lt.s32.totalorder %v1920_v18, %v1911_v16  ;;  %v1388_v18 = vpack.c.bf16 %v1882_v1, %v1882_v1  ;;  %v1096_v1 = vsel %vm2409_vm2, %v2172_v55, 0.0 }
 0x175   :  { %v1166_v7 = vmul.f32 %v1096_v1, %v1096_v1 }
 0x177   :  { %919 = vadd.xlane.f32.xlu1 %v893_v50  ;;  %921 = vadd.xlane.f32.xlu0 %v894_v53  ;;  %v1025_v50 = vld [vmem:[%s1964_s11 + $0x18] sm:$0xff]  ;;  %v1408_v53 = vpack.c.bf16 %v1027_v41, %v1026_v39 }
 0x179   :  { %1528 = vmatpush3.bf16.xpose.msk.msra.mxu1 %vm1372_vm7, %v1373_v2  ;;  %vm2404_vm7 = vcmp.lt.s32.totalorder %v1988_v31, %v1911_v16  ;;  %v1382_v2 = vpack.c.bf16 %v2004_v36, %v2001_v35  ;;  %v1163_v16 = vmul.f32 %v1093_v19, %v1093_v19  ;;  %v1094_v35 = vsel %vm1046_vm1, %v2217_v15, 0.0 }
 0x17a   :  { %1548 = vmatpush3.bf16.xpose.msk.msra.mxu0 %vm1401_vm8, %v1402_v47  ;;  %1529 = vmatprep.subr.bf16.mxu1 %v1806_v60  ;;  %vm1378_vm8 = vmpackc.low %vm2404_vm7, %vm2403_vm9  ;;  %vm1042_vm7 = vcmp.lt.s32.totalorder %v1930_v20, %v1913_v17  ;;  %v1411_v47 = vpack.c.bf16 %v1025_v50, %v1024_v57  ;;  %v1417_v36 = vpack.c.bf16 %v1898_v9, %v1898_v9 }
 0x17b   :  { %923 = vadd.xlane.f32.xlu1 %v895_v5  ;;  %925 = vadd.xlane.f32.xlu0 %v896_v6  ;;  %v1090_v0 = vsel %vm1042_vm7, %v1025_v50, 0.0  ;;  %vm2412_vm1 = vcmp.lt.s32.totalorder %v2007_v37, %v1913_v17 }
 0x17c   :  { %1549 = vmatprep.subr.bf16.mxu0 %v1806_v60  ;;  %v1160_v44 = vmul.f32 %v1090_v0, %v1090_v0  ;;  %v1099_v61 = vsel %vm2412_vm1, %v2053_v51, 0.0 }
 0x17f   :  { %927 = vadd.xlane.f32.xlu1 %v897_v11  ;;  %929 = vadd.xlane.f32.xlu0 %v898_v12 }
 0x181   :  { %1530 = vmatpush3.bf16.xpose.msk.msra.mxu1 %vm1375_vm4, %v1376_v21  ;;  %vm1043_vm4 = vcmp.lt.s32.totalorder %v1985_v30, %v1913_v17 }
 0x182   :  { %1550 = vmatpush3.bf16.xpose.msk.msra.mxu0 %vm1404_vm6, %v1405_v33  ;;  %1531 = vmatprep.subr.bf16.mxu1 %v1806_v60  ;;  %vm1044_vm6 = vcmp.lt.s32.totalorder %v1988_v31, %v1913_v17  ;;  %v1091_v45 = vsel %vm1043_vm4, %v1026_v39, 0.0  ;;  %v1385_v31 = vpack.c.bf16 %v1977_v28, %v1980_v29  ;;  %v1164_v28 = vmul.f32 %v1094_v35, %v1094_v35 }
 0x183   :  { %1173 = vadd.xlane.f32.xlu0 %v1157_v34  ;;  %1551 = vmatprep.subr.bf16.mxu0 %v1806_v60  ;;  %vm1407_vm9 = vmpackc.low %vm1044_vm6, %vm1043_vm4  ;;  %v1161_v5 = vmul.f32 %v1091_v45, %v1091_v45  ;;  %v1092_v20 = vsel %vm1044_vm6, %v1027_v41, 0.0  ;;  %v1095_v29 = vsel %vm1047_vm13, %v2169_v54, 0.0  ;;  %vm2411_vm13 = vcmp.lt.s32.totalorder %v2106_v4, %v1913_v17 }
 0x184   :  { %v1162_v30 = vmul.f32 %v1092_v20, %v1092_v20  ;;  %v1165_v63 = vmul.f32 %v1095_v29, %v1095_v29  ;;  %v1098_v9 = vsel %vm2411_vm13, %v2134_v26, 0.0  ;;  %v1169_v54 = vmul.f32 %v1099_v61, %v1099_v61 }
 0x185   :  { %v1168_v59 = vmul.f32 %v1098_v9, %v1098_v9  ;;  %vm2414_vm4 = vcmp.lt.s32.totalorder %v1905_v13, %v1913_v17  ;;  %vm2415_vm6 = vcmp.lt.s32.totalorder %v1908_v14, %v1913_v17 }
 0x186   :  { %v1101_v4 = vsel %vm2414_vm4, %v1967_v25, 0.0  ;;  %v1102_v37 = vsel %vm2415_vm6, %v1974_v27, 0.0 }
 0x187   :  { %1175 = vadd.xlane.f32.xlu0 %v1158_v38  ;;  %v1171_v26 = vmul.f32 %v1101_v4, %v1101_v4  ;;  %v1172_v51 = vmul.f32 %v1102_v37, %v1102_v37 }
 0x189   :  { %1532 = vmatpush3.bf16.xpose.msk.msra.mxu1 %vm1378_vm8, %v1379_v49  ;;  %vm1410_vm8 = vmpackc.low %vm1042_vm7, %vm1041_vm11 }
 0x18a   :  { %1552 = vmatpush3.bf16.xpose.msk.msra.mxu0 %vm1407_vm9, %v1408_v53  ;;  %1533 = vmatprep.subr.bf16.mxu1 %v1806_v60  ;;  %vm1384_vm11 = vmpackc.low %vm2408_vm15, %vm2407_vm12 }
 0x18b   :  { %1177 = vadd.xlane.f32.xlu0 %v1159_v62  ;;  %1553 = vmatprep.subr.bf16.mxu0 %v1806_v60 }
 0x18f   :  { %1179 = vadd.xlane.f32.xlu0 %v1160_v44 }
 0x191   :  { %1534 = vmatpush3.bf16.xpose.msk.msra.mxu1 %vm1381_vm14, %v1382_v2  ;;  %vm1413_vm14 = vmpackc.low %vm1040_vm10, %vm1039_vm0  ;;  %vm2413_vm10 = vcmp.lt.s32.totalorder %v2012_v40, %v1913_v17 }
 0x192   :  { %1554 = vmatpush3.bf16.xpose.msk.msra.mxu0 %vm1410_vm8, %v1411_v47  ;;  %1535 = vmatprep.subr.bf16.mxu1 %v1806_v60  ;;  %vm1416_vm0 = vmpackc.low %vm1892_vm3, %vm1892_vm3  ;;  %vm2410_vm3 = vcmp.lt.s32.totalorder %v2103_v3, %v1913_v17  ;;  %v1100_v3 = vsel %vm2413_vm10, %v2056_v52, 0.0 }
 0x193   :  { %1181 = vadd.xlane.f32.xlu0 %v1161_v5  ;;  %1555 = vmatprep.subr.bf16.mxu0 %v1806_v60  ;;  %v1414_v60 = vpack.c.bf16 %v1023_v32, %v2210_v10  ;;  %v1097_v43 = vsel %vm2410_vm3, %v2131_v22, 0.0  ;;  %v1170_v22 = vmul.f32 %v1100_v3, %v1100_v3 }
 0x194   :  { %v1167_v46 = vmul.f32 %v1097_v43, %v1097_v43 }
 0x197   :  { %1183 = vadd.xlane.f32.xlu0 %v1162_v30 }
 0x199   :  { %1536 = vmatpush3.bf16.xpose.msk.msra.mxu1 %vm1384_vm11, %v1385_v31 }
 0x19a   :  { %1556 = vmatpush3.bf16.xpose.msk.msra.mxu0 %vm1413_vm14, %v1414_v60 }
 0x19b   :  { %1185 = vadd.xlane.f32.xlu0 %v1163_v16 }
 0x19f   :  { %1187 = vadd.xlane.f32.xlu0 %v1164_v28 }
 0x1a0   :  { %1538 = vmatmul.mubr.msk.bf16.vlgmr.msra.gmra.mxu1 %vm1387_vm5, %v1388_v18 }
 0x1a1   :  { %1558 = vmatmul.mubr.msk.bf16.vlgmr.msra.gmra.mxu0 %vm1416_vm0, %v1417_v36 }
 0x1a3   :  { %1189 = vadd.xlane.f32.xlu0 %v1165_v63 }
 0x1a7   :  { %1191 = vadd.xlane.f32.xlu0 %v1166_v7 }
 0x1ab   :  { %1193 = vadd.xlane.f32.xlu0 %v1167_v46 }
 0x1af   :  { %1195 = vadd.xlane.f32.xlu0 %v1168_v59 }
 0x1b3   :  { %1197 = vadd.xlane.f32.xlu0 %v1169_v54 }
 0x1b7   :  { %1199 = vadd.xlane.f32.xlu0 %v1170_v22 }
 0x1bb   :  { %1201 = vadd.xlane.f32.xlu0 %v1171_v26 }
 0x1bf   :  { %1203 = vadd.xlane.f32.xlu0 %v1172_v51 }
 0x1d7   :  { %v2364_v55 = vpop.xlane.xlu0 %879 }
 0x1df   :  { %v2366_v40 = vpop.xlane.xlu0 %1153 }
 0x1ec   :  { %v902_v52 = vpop.xlane.xlu1 %901  ;;  %v900_v6 = vpop.xlane.xlu0 %899 }
 0x1ed   :  { %v931_v48 = vadd.f32 1e-08, %v900_v6  ;;  %v932_v8 = vadd.f32 1e-08, %v902_v52 }
 0x1ef   :  { %1655 = vrsqrt.f32 %v931_v48 }
 0x1f0   :  { %v906_v13 = vpop.xlane.xlu0 %905  ;;  %v904_v25 = vpop.xlane.xlu1 %903  ;;  %1657 = vrsqrt.f32 %v932_v8 }
 0x1f1   :  { %v933_v10 = vadd.f32 1e-08, %v904_v25  ;;  %v934_v14 = vadd.f32 1e-08, %v906_v13 }
 0x1f3   :  { %1659 = vrsqrt.f32 %v933_v10 }
 0x1f4   :  { %v910_v11 = vpop.xlane.xlu0 %909  ;;  %v908_v27 = vpop.xlane.xlu1 %907  ;;  %1661 = vrsqrt.f32 %v934_v14 }
 0x1f5   :  { %v935_v12 = vadd.f32 1e-08, %v908_v27  ;;  %v936_v24 = vadd.f32 1e-08, %v910_v11 }
 0x1f7   :  { %1663 = vrsqrt.f32 %v935_v12 }
 0x1f8   :  { %v914_v17 = vpop.xlane.xlu0 %913  ;;  %v912_v33 = vpop.xlane.xlu1 %911  ;;  %1665 = vrsqrt.f32 %v936_v24 }
 0x1f9   :  { %v937_v34 = vadd.f32 1e-08, %v912_v33  ;;  %v938_v38 = vadd.f32 1e-08, %v914_v17 }
 0x1fb   :  { %1667 = vrsqrt.f32 %v937_v34 }
 0x1fc   :  { %v918_v23 = vpop.xlane.xlu0 %917  ;;  %v1656_v15 = vpop.eup %1655  ;;  %1669 = vrsqrt.f32 %v938_v38 }
 0x1fd   :  { %964 = vxpose.xlu1.b32.start [1/16] (narrow) %v1656_v15, 8  ;;  %v1658_v32 = vpop.eup %1657  ;;  %v916_v42 = vpop.xlane.xlu1 %915  ;;  %v940_v0 = vadd.f32 1e-08, %v918_v23 }
 0x1fe   :  { %v939_v49 = vadd.f32 1e-08, %v916_v42 }
 0x200   :  { %v922_v21 = vpop.xlane.xlu0 %921  ;;  %v1660_v57 = vpop.eup %1659 }
 0x201   :  { %965 = vxpose.xlu1.b32.cont [2/16] (narrow) %v1658_v32, 8  ;;  %v1662_v41 = vpop.eup %1661  ;;  %v920_v2 = vpop.xlane.xlu1 %919  ;;  %v942_v31 = vadd.f32 1e-08, %v922_v21 }
 0x202   :  { %v941_v5 = vadd.f32 1e-08, %v920_v2 }
 0x204   :  { %v926_v56 = vpop.xlane.xlu0 %925  ;;  %v1664_v53 = vpop.eup %1663 }
 0x205   :  { %966 = vxpose.xlu1.b32.cont [3/16] (narrow) %v1660_v57, 8  ;;  %v1666_v45 = vpop.eup %1665  ;;  %v924_v35 = vpop.xlane.xlu1 %923  ;;  %v944_v43 = vadd.f32 1e-08, %v926_v56 }
 0x206   :  { %v943_v29 = vadd.f32 1e-08, %v924_v35 }
 0x208   :  { %v2368_v39 = vpop.xlane.xlu0 %929  ;;  %v1668_v30 = vpop.eup %1667 }
 0x209   :  { %967 = vxpose.xlu1.b32.cont [4/16] (narrow) %v1662_v41, 8  ;;  %v1670_v16 = vpop.eup %1669  ;;  %v928_v59 = vpop.xlane.xlu1 %927  ;;  %v946_v51 = vadd.f32 1e-08, %v2368_v39 }
 0x20a   :  { %v945_v3 = vadd.f32 1e-08, %v928_v59 }
 0x20c   :  { %v1174_v50 = vpop.xlane.xlu0 %1173 }
 0x20d   :  { %v1205_v62 = vadd.f32 1e-08, %v1174_v50  ;;  %968 = vxpose.xlu1.b32.cont [5/16] (narrow) %v1664_v53, 8 }
 0x20f   :  { %1671 = vrsqrt.f32 %v1205_v62 }
 0x210   :  { %1673 = vrsqrt.f32 %v939_v49  ;;  %v1176_v44 = vpop.xlane.xlu0 %1175 }
 0x211   :  { %v1206_v47 = vadd.f32 1e-08, %v1176_v44  ;;  %969 = vxpose.xlu1.b32.cont [6/16] (narrow) %v1666_v45, 8 }
 0x213   :  { %1675 = vrsqrt.f32 %v1206_v47 }
 0x214   :  { %1677 = vrsqrt.f32 %v940_v0  ;;  %v1178_v20 = vpop.xlane.xlu0 %1177 }
 0x215   :  { %v1207_v19 = vadd.f32 1e-08, %v1178_v20  ;;  %970 = vxpose.xlu1.b32.cont [7/16] (narrow) %v1668_v30, 8 }
 0x217   :  { %1679 = vrsqrt.f32 %v1207_v19 }
 0x218   :  { %1681 = vrsqrt.f32 %v941_v5  ;;  %v1180_v60 = vpop.xlane.xlu0 %1179 }
 0x219   :  { %v1208_v28 = vadd.f32 1e-08, %v1180_v60  ;;  %971 = vxpose.xlu1.b32.cont [8/16] (narrow) %v1670_v16, 8 }
 0x21b   :  { %1683 = vrsqrt.f32 %v1208_v28 }
 0x21c   :  { %v1672_v18 = vpop.eup %1671  ;;  %1685 = vrsqrt.f32 %v942_v31  ;;  %v1182_v36 = vpop.xlane.xlu0 %1181 }
 0x21d   :  { %v1674_v63 = vpop.eup %1673  ;;  %v1209_v1 = vadd.f32 1e-08, %v1182_v36  ;;  %1238 = vxpose.xlu0.b32.start [1/16] (narrow) %v1672_v18, 8  ;;  %v881_v18 = vadd.f32 1e-08, %v2364_v55 }
 0x21e   :  { %972 = vxpose.xlu1.b32.cont [9/16] (narrow) %v1674_v63, 8 }
 0x21f   :  { %1687 = vrsqrt.f32 %v1209_v1 }
 0x220   :  { %v1676_v7 = vpop.eup %1675  ;;  %1689 = vrsqrt.f32 %v943_v29  ;;  %v1184_v46 = vpop.xlane.xlu0 %1183  ;;  %v998_v29 = vsub.s32 0, %v1871_v58 }
 0x221   :  { %v1678_v9 = vpop.eup %1677  ;;  %v1210_v61 = vadd.f32 1e-08, %v1184_v46  ;;  %1239 = vxpose.xlu0.b32.cont [2/16] (narrow) %v1676_v7, 8  ;;  %v1155_v46 = vadd.f32 1e-08, %v2366_v40 }
 0x222   :  { %973 = vxpose.xlu1.b32.cont [10/16] (narrow) %v1678_v9, 8 }
 0x223   :  { %1691 = vrsqrt.f32 %v1210_v61 }
 0x224   :  { %v1680_v54 = vpop.eup %1679  ;;  %1693 = vrsqrt.f32 %v944_v43  ;;  %v1186_v22 = vpop.xlane.xlu0 %1185 }
 0x225   :  { %v1682_v4 = vpop.eup %1681  ;;  %v1211_v26 = vadd.f32 1e-08, %v1186_v22  ;;  %1240 = vxpose.xlu0.b32.cont [3/16] (narrow) %v1680_v54, 8 }
 0x226   :  { %974 = vxpose.xlu1.b32.cont [11/16] (narrow) %v1682_v4, 8 }
 0x227   :  { %1695 = vrsqrt.f32 %v1211_v26 }
 0x228   :  { %v1684_v37 = vpop.eup %1683  ;;  %1697 = vrsqrt.f32 %v945_v3  ;;  %v1188_v52 = vpop.xlane.xlu0 %1187 }
 0x229   :  { %v1686_v6 = vpop.eup %1685  ;;  %v1212_v48 = vadd.f32 1e-08, %v1188_v52  ;;  %1241 = vxpose.xlu0.b32.cont [4/16] (narrow) %v1684_v37, 8 }
 0x22a   :  { %975 = vxpose.xlu1.b32.cont [12/16] (narrow) %v1686_v6, 8 }
 0x22b   :  { %1699 = vrsqrt.f32 %v1212_v48 }
 0x22c   :  { %v1688_v8 = vpop.eup %1687  ;;  %1701 = vrsqrt.f32 %v946_v51  ;;  %v1190_v13 = vpop.xlane.xlu0 %1189 }
 0x22d   :  { %v1690_v25 = vpop.eup %1689  ;;  %v1213_v10 = vadd.f32 1e-08, %v1190_v13  ;;  %1242 = vxpose.xlu0.b32.cont [5/16] (narrow) %v1688_v8, 8 }
 0x22e   :  { %976 = vxpose.xlu1.b32.cont [13/16] (narrow) %v1690_v25, 8 }
 0x22f   :  { %1703 = vrsqrt.f32 %v1213_v10 }
 0x230   :  { %v1692_v11 = vpop.eup %1691  ;;  %v1192_v14 = vpop.xlane.xlu0 %1191 }
 0x231   :  { %v1694_v17 = vpop.eup %1693  ;;  %v1214_v27 = vadd.f32 1e-08, %v1192_v14  ;;  %1243 = vxpose.xlu0.b32.cont [6/16] (narrow) %v1692_v11, 8 }
 0x232   :  { %977 = vxpose.xlu1.b32.cont [14/16] (narrow) %v1694_v17, 8 }
 0x233   :  { %1705 = vrsqrt.f32 %v1214_v27 }
 0x234   :  { %v1696_v12 = vpop.eup %1695  ;;  %v1194_v23 = vpop.xlane.xlu0 %1193 }
 0x235   :  { %v1698_v15 = vpop.eup %1697  ;;  %v1215_v24 = vadd.f32 1e-08, %v1194_v23  ;;  %1244 = vxpose.xlu0.b32.cont [7/16] (narrow) %v1696_v12, 8 }
 0x236   :  { %978 = vxpose.xlu1.b32.cont [15/16] (narrow) %v1698_v15, 8 }
 0x237   :  { %1707 = vrsqrt.f32 %v1215_v24 }
 0x238   :  { %v1700_v21 = vpop.eup %1699  ;;  %v1196_v32 = vpop.xlane.xlu0 %1195 }
 0x239   :  { %v1702_v33 = vpop.eup %1701  ;;  %v1216_v34 = vadd.f32 1e-08, %v1196_v32  ;;  %1245 = vxpose.xlu0.b32.cont [8/16] (narrow) %v1700_v21, 8 }
 0x23a   :  { %979 = vxpose.xlu1.b32.end [16/16] (narrow) %v1702_v33, 8 }
 0x23b   :  { %1709 = vrsqrt.f32 %v1216_v34 }
 0x23c   :  { %v1704_v56 = vpop.eup %1703  ;;  %v1198_v57 = vpop.xlane.xlu0 %1197 }
 0x23d   :  { %v1217_v38 = vadd.f32 1e-08, %v1198_v57  ;;  %1246 = vxpose.xlu0.b32.cont [9/16] (narrow) %v1704_v56, 8 }
 0x23f   :  { %1711 = vrsqrt.f32 %v1217_v38 }
 0x240   :  { %v1706_v39 = vpop.eup %1705  ;;  %v1200_v41 = vpop.xlane.xlu0 %1199 }
 0x241   :  { %v1218_v42 = vadd.f32 1e-08, %v1200_v41  ;;  %1247 = vxpose.xlu0.b32.cont [10/16] (narrow) %v1706_v39, 8 }
 0x243   :  { %1713 = vrsqrt.f32 %v1218_v42 }
 0x244   :  { %v1708_v49 = vpop.eup %1707  ;;  %v1202_v50 = vpop.xlane.xlu0 %1201 }
 0x245   :  { %v1219_v53 = vadd.f32 1e-08, %v1202_v50  ;;  %1248 = vxpose.xlu0.b32.cont [11/16] (narrow) %v1708_v49, 8 }
 0x247   :  { %1715 = vrsqrt.f32 %v1219_v53 }
 0x248   :  { %v1710_v62 = vpop.eup %1709  ;;  %v1204_v0 = vpop.xlane.xlu0 %1203 }
 0x249   :  { %v1220_v44 = vadd.f32 1e-08, %v1204_v0  ;;  %1249 = vxpose.xlu0.b32.cont [12/16] (narrow) %v1710_v62, 8 }
 0x24b   :  { %1717 = vrsqrt.f32 %v1220_v44 }
 0x24c   :  { %v1712_v45 = vpop.eup %1711  ;;  %1719 = vrsqrt.f32 %v881_v18 }
 0x24d   :  { %1250 = vxpose.xlu0.b32.cont [13/16] (narrow) %v1712_v45, 8  ;;  %1721 = vrsqrt.f32 %v1155_v46 }
 0x250   :  { %v1714_v2 = vpop.eup %1713 }
 0x251   :  { %1251 = vxpose.xlu0.b32.cont [14/16] (narrow) %v1714_v2, 8 }
 0x254   :  { %v1716_v47 = vpop.eup %1715 }
 0x255   :  { %1252 = vxpose.xlu0.b32.cont [15/16] (narrow) %v1716_v47, 8 }
 0x258   :  { %v1718_v5 = vpop.eup %1717 }
 0x259   :  { %1253 = vxpose.xlu0.b32.end [16/16] (narrow) %v1718_v5, 8  ;;  %v1720_v36 = vpop.eup %1719 }
 0x25a   :  { %v1722_v9 = vpop.eup %1721 }
 0x260   :  { %v872_v20 = vpop.f32.mrf.mxu1 }
 0x261   :  { %v1146_v30 = vpop.f32.mrf.mxu0  ;;  %v963_v1 = vmul.f32 %v1720_v36, %v872_v20 }
 0x262   :  { %v1539_v19 = vpop.f32.mrf.mxu1  ;;  %v1237_v61 = vmul.f32 %v1722_v9, %v1146_v30 }
 0x263   :  { %v1559_v31 = vpop.f32.mrf.mxu0 }
 0x264   :  { %v875_v60 = vpop.f32.mrf.mxu1 }
 0x265   :  { %v1149_v16 = vpop.f32.mrf.mxu0 }
 0x266   :  { %v1540_v35 = vpop.f32.mrf.mxu1 }
 0x267   :  { %v1560_v28 = vpop.f32.mrf.mxu0 }
 0x27a   :  { %v980_v63 = vpop.trf.xlu1 }
 0x27b   :  { %v999_v7 = vrot.slane %v980_v63, %v998_v29 }
 0x27d   :  { %v1000_v43 = vmul.f32 %v999_v7, %v963_v1 }
 0x27f   :  { %1001 = vst [vmem:[#allocation10] sm:$0xff] %v1000_v43 }
 0x299   :  { %v1254_v59 = vpop.trf.xlu0 }
 0x29a   :  { %v1273_v54 = vrot.slane %v1254_v59, %v998_v29 }
 0x29c   :  { %v1274_v3 = vmul.f32 %v1273_v54, %v1237_v61 }
 0x29e   :  { %1276 = vst [vmem:[#allocation10 + $0x8] sm:$0xff] %v1274_v3 }
 0x29f   :  { %1782 = shalt.err (!%p1779_p2)
}
 0x2a0   :  { %s1809_s15 = smov 128   ;;  %s1810_s16 = smov 8  }
 0x2a1   :  { %1288 = dma.vmem_to_hbm [thread:$0]  %s1283_s13, 256, %s2381_s4, [#allocation7], %s1809_s15, %s1809_s15, %s1810_s16  }
 0x2a2   :  { %1797 = dma.done.wait [#allocation7], 256  }
 0x2a3   :  { %1798 = vsyncadd [#allocation7], 4294967040 }
 0x2a4   :  { %1292 = vsyncpa [#allocation6], 1 }
 0x2a5   :  { %1293 = vsyncpa [#allocation9], 1 }
 0x2a6   :  { %1294 = vsyncpa [#allocation7], 1 }

</bundles_post_ra>
